<compile_context>
chip_gen: v5e
topology: v5e:2x2
jax: 0.10.0
libtpu: 0.0.40
codegen_flags: <defaults>
</compile_context>

<pallas_src>
import functools
import math

import numpy as np
import jax
import jax.numpy as jnp
from jax import lax
from jax.experimental import pallas as pl
from jax.experimental.pallas import tpu as pltpu

FEATURE_DIM = 32      # D
NUM_PROTOS = 5        # N
LN_EPS = 1e-5         # nn.LayerNorm default eps
LANES = 128           # TPU vreg lane width
N_PAD = 8             # prototype slots per logical row (padded, power of two)


def _round_up(x, m):
    return (x + m - 1) // m * m


def _choose_tiling(r4):
    """Packed-row tile (tm4) and number of grid steps.

    Small problems: one step (v5e/v6e have a single TensorCore, so a multi
    step 'parallel' grid would just be a serial loop).  Large problems: an
    even number of ~1 MiB steps so v7x can split the axis across both cores.
    """
    max_tm4 = 2048                              # 2048 * 512 B = 1 MiB / block
    if r4 <= 1024:
        return r4, 1                            # block == full array dims
    steps = max(2, 2 * pl.cdiv(r4, 2 * max_tm4))
    tm4 = _round_up(pl.cdiv(r4, steps), 8)
    steps = pl.cdiv(r4, tm4)
    return tm4, steps


def _proto_interaction_kernel(x_ref, kt_ref, v_ref, rot_ref, ssum_ref,
                              mmean_ref, wt_ref, bias_ref, o_ref, *, d):
    """Lane-dense packed body.

    Each 128-lane row of x_ref holds 128//d logical feature rows.  Weights
    are block-diagonal, so logical rows never mix; per-row reductions
    (softmax max/sum, LayerNorm mean/var) run as selector / permutation
    matmuls on the MXU, keeping the VPU/EUP lanes 100% useful.
    """
    x = x_ref[...].astype(jnp.float32)                                # [TM4, 128]
    scale = jnp.float32(d ** (-0.5))

    # --- attention logits over prototypes, packed [TM4, PACK * N_PAD] -----
    logits = jnp.dot(x, kt_ref[...],
                     preferred_element_type=jnp.float32) * scale

    # per-group (N_PAD-lane) max via cyclic-rotation doubling (3 tiny matmuls)
    m = logits
    for k in range(3):                                   # shifts 4, 2, 1
        m = jnp.maximum(m, jnp.dot(m, rot_ref[k],
                                   preferred_element_type=jnp.float32))
    p = jnp.exp(logits - m)
    # group sum over the NUM_PROTOS valid slots only, broadcast back to every
    # lane of its group by the selector matmul; padded slots never contribute.
    denom = jnp.dot(p, ssum_ref[...], preferred_element_type=jnp.float32)
    attn = p / denom                                     # exact division

    # normality context; padded prototype-value rows are zero
    ctx = jnp.dot(attn, v_ref[...], preferred_element_type=jnp.float32)  # [TM4, 128]

    # --- residual + LayerNorm (segmented over d-lane groups) --------------
    comb = x + ctx
    mean = jnp.dot(comb, mmean_ref[...], preferred_element_type=jnp.float32)
    cen = comb - mean
    var = jnp.dot(cen * cen, mmean_ref[...], preferred_element_type=jnp.float32)
    normed = cen * lax.rsqrt(var + LN_EPS)

    # --- projection (LN affine + bias pre-folded) + exact GELU ------------
    proj = jnp.dot(normed, wt_ref[...],
                   preferred_element_type=jnp.float32) + bias_ref[...]
    inv_sqrt2 = jnp.float32(1.0 / math.sqrt(2.0))
    gelu = 0.5 * proj * (1.0 + lax.erf(proj * inv_sqrt2))

    # Dropout is identity at inference time.
    # TODO(synk): training-mode dropout (random mask + 1/(1-p) scaling) not implemented.
    o_ref[...] = gelu.astype(o_ref.dtype)


def prototype_interaction(features, proto_keys, proto_values,
                          ln_gamma, ln_beta, proj_w, proj_b):
    """features: [B, T, D]; proto_keys/values: [N, D]; proj_w: [D, D] (out, in)."""
    B, T, D = features.shape
    N = proto_keys.shape[0]
    assert LANES % D == 0, "lane packing requires D to divide 128"
    assert N <= N_PAD, "prototype count must fit the padded slot width"
    pack = LANES // D                       # logical rows per 128-lane row
    G = pack * N_PAD                        # packed logit lanes

    f32 = jnp.float32
    eye_p = np.eye(pack, dtype=np.float32)

    # ---- prototype keys: [D, N_PAD] zero padded, then block-diagonal -----
    kt = jnp.zeros((D, N_PAD), f32).at[:, :N].set(proto_keys.astype(f32).T)
    kt_blk = jnp.kron(jnp.asarray(eye_p), kt)                    # [128, G]

    # ---- prototype values: padded rows are zero ---------------------------
    v = jnp.zeros((N_PAD, D), f32).at[:N, :].set(proto_values.astype(f32))
    v_blk = jnp.kron(jnp.asarray(eye_p), v)                      # [G, 128]

    # ---- constant selector / permutation matrices (host-built) -----------
    def _rot8(s):
        r = np.zeros((N_PAD, N_PAD), np.float32)
        for j in range(N_PAD):
            r[(j + s) % N_PAD, j] = 1.0
        return r
    rot = np.stack([np.kron(eye_p, _rot8(s)) for s in (4, 2, 1)])  # [3, G, G]
    s8 = np.zeros((N_PAD, N_PAD), np.float32)
    s8[:N, :] = 1.0                                               # valid slots only
    ssum = np.kron(eye_p, s8)                                     # [G, G]
    mmean = np.kron(eye_p, np.full((D, D), 1.0 / D, np.float32))  # [128, 128]

    # ---- fold LayerNorm affine + Linear bias into the projection ---------
    wt = proj_w.astype(f32).T                                     # W^T [D, D]
    wt_aff = ln_gamma.astype(f32)[:, None] * wt                   # diag(gamma) @ W^T
    b_aff = ln_beta.astype(f32) @ wt + proj_b.astype(f32)         # beta @ W^T + b
    wt_blk = jnp.kron(jnp.asarray(eye_p), wt_aff)                 # [128, 128]
    bias_blk = jnp.tile(b_aff, pack).reshape(1, LANES)            # [1, 128]

    # ---- lane-dense packing of the rows -----------------------------------
    rows = B * T
    r4 = pl.cdiv(rows, pack)                     # packed rows
    tm4, steps = _choose_tiling(r4)
    r4_pad = tm4 * steps
    rows_pad = r4_pad * pack

    x2 = features.reshape(rows, D)
    if rows_pad != rows:                         # copy only when shapes require it
        x2 = jnp.pad(x2, ((0, rows_pad - rows), (0, 0)))
    xp = x2.reshape(r4_pad, LANES)               # free reshape for row-major input

    grid_spec = pltpu.PrefetchScalarGridSpec(
        num_scalar_prefetch=0,
        grid=(steps,),
        in_specs=[
            pl.BlockSpec((tm4, LANES), lambda i: (i, 0)),     # packed features
            pl.BlockSpec((LANES, G), lambda i: (0, 0)),       # K^T block-diag
            pl.BlockSpec((G, LANES), lambda i: (0, 0)),       # V block-diag
            pl.BlockSpec((3, G, G), lambda i: (0, 0, 0)),     # rotation mats (max tree)
            pl.BlockSpec((G, G), lambda i: (0, 0)),           # softmax sum selector
            pl.BlockSpec((LANES, LANES), lambda i: (0, 0)),   # LN mean selector
            pl.BlockSpec((LANES, LANES), lambda i: (0, 0)),   # folded W^T block-diag
            pl.BlockSpec((1, LANES), lambda i: (0, 0)),       # folded bias
        ],
        out_specs=pl.BlockSpec((tm4, LANES), lambda i: (i, 0)),
    )

    itemsize = jnp.dtype(features.dtype).itemsize
    matmul_cols = (LANES * G + 3 * G * G + G * G + G * LANES + 3 * LANES * LANES)
    cost = pl.CostEstimate(
        flops=2 * r4_pad * matmul_cols + 12 * r4_pad * LANES,
        transcendentals=r4_pad * (G + 2 * LANES),
        bytes_accessed=2 * r4_pad * LANES * itemsize
        + (2 * LANES * G + 4 * G * G + 2 * LANES * LANES + LANES) * 4,
    )

    out = pl.pallas_call(
        functools.partial(_proto_interaction_kernel, d=D),
        out_shape=jax.ShapeDtypeStruct((r4_pad, LANES), features.dtype),
        grid_spec=grid_spec,
        compiler_params=pltpu.CompilerParams(
            dimension_semantics=("parallel",)),
        cost_estimate=cost,
    )(xp, kt_blk, v_blk, jnp.asarray(rot), jnp.asarray(ssum),
      jnp.asarray(mmean), wt_blk, bias_blk)

    out = out.reshape(rows_pad, D)
    if rows_pad != rows:
        out = out[:rows]
    return out.reshape(B, T, D)


def _reference(features, proto_keys, proto_values, ln_gamma, ln_beta,
               proj_w, proj_b):
    """Pure-JAX reference matching the PyTorch forward (eval mode)."""
    D = features.shape[-1]
    scale = D ** (-0.5)
    logits = jnp.einsum("btd,nd->btn", features, proto_keys) * scale
    attn = jax.nn.softmax(logits, axis=-1)
    ctx = jnp.einsum("btn,nd->btd", attn, proto_values)
    comb = features + ctx
    mean = comb.mean(-1, keepdims=True)
    var = ((comb - mean) ** 2).mean(-1, keepdims=True)
    normed = (comb - mean) / jnp.sqrt(var + LN_EPS) * ln_gamma + ln_beta
    proj = jnp.einsum("btd,od->bto", normed, proj_w) + proj_b
    return jax.nn.gelu(proj, approximate=False)


if __name__ == "__main__":
    key = jax.random.PRNGKey(0)
    k_x, k_pk, k_pv, k_w, k_b = jax.random.split(key, 5)

    B, T, D, N = 2, 8, FEATURE_DIM, NUM_PROTOS

    features = jax.random.normal(k_x, (B, T, D), dtype=jnp.float32)
    proto_keys = 0.02 * jax.random.normal(k_pk, (N, D), dtype=jnp.float32)
    proto_values = 0.02 * jax.random.normal(k_pv, (N, D), dtype=jnp.float32)
    ln_gamma = jnp.ones((D,), dtype=jnp.float32)
    ln_beta = jnp.zeros((D,), dtype=jnp.float32)
    bound = 1.0 / math.sqrt(D)
    proj_w = jax.random.uniform(k_w, (D, D), jnp.float32, -bound, bound)
    proj_b = jax.random.uniform(k_b, (D,), jnp.float32, -bound, bound)

    out = prototype_interaction(features, proto_keys, proto_values,
                                ln_gamma, ln_beta, proj_w, proj_b)
    out = jax.block_until_ready(out)

    ref = _reference(features, proto_keys, proto_values, ln_gamma, ln_beta,
                     proj_w, proj_b)
    assert out.shape == (B, T, D)
    assert jnp.allclose(out, ref, atol=2e-4, rtol=2e-4), "mismatch vs reference"

    print("KERNEL_OK")
</pallas_src>

<mosaic_0001>
module attributes {stable_mosaic.version = 11 : i64} {
  func.func @_proto_interaction_kernel(%arg0: i32, %arg1: memref<4x128xf32, #tpu.memory_space<vmem>>, %arg2: memref<128x32xf32, #tpu.memory_space<vmem>>, %arg3: memref<32x128xf32, #tpu.memory_space<vmem>>, %arg4: memref<3x32x32xf32, #tpu.memory_space<vmem>>, %arg5: memref<32x32xf32, #tpu.memory_space<vmem>>, %arg6: memref<128x128xf32, #tpu.memory_space<vmem>>, %arg7: memref<128x128xf32, #tpu.memory_space<vmem>>, %arg8: memref<1x128xf32, #tpu.memory_space<vmem>>, %arg9: memref<4x128xf32, #tpu.memory_space<vmem>>) attributes {dimension_semantics = [#tpu.dimension_semantics<parallel>], iteration_bounds = array<i64: 1>, scalar_prefetch = 0 : i64, scratch_operands = 0 : i64, tpu.core_type = #tpu.core_type<tc>, window_params = [{transform_indices = @transform_0, window_bounds = array<i64: 4, 128>}, {pipeline_mode = #tpu.pipeline_mode<synchronous>, transform_indices = @transform_1, window_bounds = array<i64: 128, 32>}, {pipeline_mode = #tpu.pipeline_mode<synchronous>, transform_indices = @transform_2, window_bounds = array<i64: 32, 128>}, {pipeline_mode = #tpu.pipeline_mode<synchronous>, transform_indices = @transform_3, window_bounds = array<i64: 3, 32, 32>}, {pipeline_mode = #tpu.pipeline_mode<synchronous>, transform_indices = @transform_4, window_bounds = array<i64: 32, 32>}, {pipeline_mode = #tpu.pipeline_mode<synchronous>, transform_indices = @transform_5, window_bounds = array<i64: 128, 128>}, {pipeline_mode = #tpu.pipeline_mode<synchronous>, transform_indices = @transform_6, window_bounds = array<i64: 128, 128>}, {pipeline_mode = #tpu.pipeline_mode<synchronous>, transform_indices = @transform_7, window_bounds = array<i64: 1, 128>}, {transform_indices = @transform_8, window_bounds = array<i64: 4, 128>}]} {
    %c0 = arith.constant 0 : index
    %c0_0 = arith.constant 0 : index
    %0 = vector.load %arg1[%c0, %c0_0] : memref<4x128xf32, #tpu.memory_space<vmem>>, vector<4x128xf32>
    %c0_1 = arith.constant 0 : index
    %c0_2 = arith.constant 0 : index
    %1 = vector.load %arg2[%c0_1, %c0_2] : memref<128x32xf32, #tpu.memory_space<vmem>>, vector<128x32xf32>
    %cst = arith.constant dense<0.000000e+00> : vector<4x32xf32>
    %2 = tpu.matmul %0, %1, %cst {dimension_numbers = #tpu.dot_dimension_numbers<[1], [0], [0], [1], [0, 0, 1, 1], [], []>} : vector<4x128xf32>, vector<128x32xf32>, vector<4x32xf32> -> vector<4x32xf32>
    %cst_3 = arith.constant 0.176776692 : f32
    %3 = vector.broadcast %cst_3 : f32 to vector<4x32xf32>
    %4 = arith.mulf %2, %3 : vector<4x32xf32>
    %c0_4 = arith.constant 0 : index
    %c0_5 = arith.constant 0 : index
    %c0_6 = arith.constant 0 : index
    %5 = vector.load %arg4[%c0_4, %c0_5, %c0_6] : memref<3x32x32xf32, #tpu.memory_space<vmem>>, vector<1x32x32xf32>
    %6 = vector.shape_cast %5 : vector<1x32x32xf32> to vector<32x32xf32>
    %cst_7 = arith.constant dense<0.000000e+00> : vector<4x32xf32>
    %7 = tpu.matmul %4, %6, %cst_7 {dimension_numbers = #tpu.dot_dimension_numbers<[1], [0], [0], [1], [0, 0, 1, 1], [], []>} : vector<4x32xf32>, vector<32x32xf32>, vector<4x32xf32> -> vector<4x32xf32>
    %8 = arith.maximumf %4, %7 : vector<4x32xf32>
    %c1 = arith.constant 1 : index
    %c0_8 = arith.constant 0 : index
    %c0_9 = arith.constant 0 : index
    %9 = vector.load %arg4[%c1, %c0_8, %c0_9] : memref<3x32x32xf32, #tpu.memory_space<vmem>>, vector<1x32x32xf32>
    %10 = vector.shape_cast %9 : vector<1x32x32xf32> to vector<32x32xf32>
    %cst_10 = arith.constant dense<0.000000e+00> : vector<4x32xf32>
    %11 = tpu.matmul %8, %10, %cst_10 {dimension_numbers = #tpu.dot_dimension_numbers<[1], [0], [0], [1], [0, 0, 1, 1], [], []>} : vector<4x32xf32>, vector<32x32xf32>, vector<4x32xf32> -> vector<4x32xf32>
    %12 = arith.maximumf %8, %11 : vector<4x32xf32>
    %c2 = arith.constant 2 : index
    %c0_11 = arith.constant 0 : index
    %c0_12 = arith.constant 0 : index
    %13 = vector.load %arg4[%c2, %c0_11, %c0_12] : memref<3x32x32xf32, #tpu.memory_space<vmem>>, vector<1x32x32xf32>
    %14 = vector.shape_cast %13 : vector<1x32x32xf32> to vector<32x32xf32>
    %cst_13 = arith.constant dense<0.000000e+00> : vector<4x32xf32>
    %15 = tpu.matmul %12, %14, %cst_13 {dimension_numbers = #tpu.dot_dimension_numbers<[1], [0], [0], [1], [0, 0, 1, 1], [], []>} : vector<4x32xf32>, vector<32x32xf32>, vector<4x32xf32> -> vector<4x32xf32>
    %16 = arith.maximumf %12, %15 : vector<4x32xf32>
    %17 = arith.subf %4, %16 : vector<4x32xf32>
    %18 = math.exp %17 : vector<4x32xf32>
    %c0_14 = arith.constant 0 : index
    %c0_15 = arith.constant 0 : index
    %19 = vector.load %arg5[%c0_14, %c0_15] : memref<32x32xf32, #tpu.memory_space<vmem>>, vector<32x32xf32>
    %cst_16 = arith.constant dense<0.000000e+00> : vector<4x32xf32>
    %20 = tpu.matmul %18, %19, %cst_16 {dimension_numbers = #tpu.dot_dimension_numbers<[1], [0], [0], [1], [0, 0, 1, 1], [], []>} : vector<4x32xf32>, vector<32x32xf32>, vector<4x32xf32> -> vector<4x32xf32>
    %21 = arith.divf %18, %20 : vector<4x32xf32>
    %c0_17 = arith.constant 0 : index
    %c0_18 = arith.constant 0 : index
    %22 = vector.load %arg3[%c0_17, %c0_18] : memref<32x128xf32, #tpu.memory_space<vmem>>, vector<32x128xf32>
    %cst_19 = arith.constant dense<0.000000e+00> : vector<4x128xf32>
    %23 = tpu.matmul %21, %22, %cst_19 {dimension_numbers = #tpu.dot_dimension_numbers<[1], [0], [0], [1], [0, 0, 1, 1], [], []>} : vector<4x32xf32>, vector<32x128xf32>, vector<4x128xf32> -> vector<4x128xf32>
    %24 = arith.addf %0, %23 : vector<4x128xf32>
    %c0_20 = arith.constant 0 : index
    %c0_21 = arith.constant 0 : index
    %25 = vector.load %arg6[%c0_20, %c0_21] : memref<128x128xf32, #tpu.memory_space<vmem>>, vector<128x128xf32>
    %cst_22 = arith.constant dense<0.000000e+00> : vector<4x128xf32>
    %26 = tpu.matmul %24, %25, %cst_22 {dimension_numbers = #tpu.dot_dimension_numbers<[1], [0], [0], [1], [0, 0, 1, 1], [], []>} : vector<4x128xf32>, vector<128x128xf32>, vector<4x128xf32> -> vector<4x128xf32>
    %27 = arith.subf %24, %26 : vector<4x128xf32>
    %28 = arith.mulf %27, %27 : vector<4x128xf32>
    %c0_23 = arith.constant 0 : index
    %c0_24 = arith.constant 0 : index
    %29 = vector.load %arg6[%c0_23, %c0_24] : memref<128x128xf32, #tpu.memory_space<vmem>>, vector<128x128xf32>
    %cst_25 = arith.constant dense<0.000000e+00> : vector<4x128xf32>
    %30 = tpu.matmul %28, %29, %cst_25 {dimension_numbers = #tpu.dot_dimension_numbers<[1], [0], [0], [1], [0, 0, 1, 1], [], []>} : vector<4x128xf32>, vector<128x128xf32>, vector<4x128xf32> -> vector<4x128xf32>
    %cst_26 = arith.constant 9.99999974E-6 : f32
    %31 = vector.broadcast %cst_26 : f32 to vector<4x128xf32>
    %32 = arith.addf %30, %31 : vector<4x128xf32>
    %33 = math.rsqrt %32 : vector<4x128xf32>
    %34 = arith.mulf %27, %33 : vector<4x128xf32>
    %c0_27 = arith.constant 0 : index
    %c0_28 = arith.constant 0 : index
    %35 = vector.load %arg7[%c0_27, %c0_28] : memref<128x128xf32, #tpu.memory_space<vmem>>, vector<128x128xf32>
    %cst_29 = arith.constant dense<0.000000e+00> : vector<4x128xf32>
    %36 = tpu.matmul %34, %35, %cst_29 {dimension_numbers = #tpu.dot_dimension_numbers<[1], [0], [0], [1], [0, 0, 1, 1], [], []>} : vector<4x128xf32>, vector<128x128xf32>, vector<4x128xf32> -> vector<4x128xf32>
    %c0_30 = arith.constant 0 : index
    %c0_31 = arith.constant 0 : index
    %37 = vector.load %arg8[%c0_30, %c0_31] : memref<1x128xf32, #tpu.memory_space<vmem>>, vector<1x128xf32>
    %38 = vector.broadcast %37 : vector<1x128xf32> to vector<4x128xf32>
    %39 = arith.addf %36, %38 : vector<4x128xf32>
    %cst_32 = arith.constant 5.000000e-01 : f32
    %40 = vector.broadcast %cst_32 : f32 to vector<4x128xf32>
    %41 = arith.mulf %40, %39 : vector<4x128xf32>
    %cst_33 = arith.constant 0.707106769 : f32
    %42 = vector.broadcast %cst_33 : f32 to vector<4x128xf32>
    %43 = arith.mulf %39, %42 : vector<4x128xf32>
    %44 = math.erf %43 : vector<4x128xf32>
    %cst_34 = arith.constant 1.000000e+00 : f32
    %45 = vector.broadcast %cst_34 : f32 to vector<4x128xf32>
    %46 = arith.addf %45, %44 : vector<4x128xf32>
    %47 = arith.mulf %41, %46 : vector<4x128xf32>
    %c0_35 = arith.constant 0 : index
    %c0_36 = arith.constant 0 : index
    %48 = vector.load %arg9[%c0_35, %c0_36] : memref<4x128xf32, #tpu.memory_space<vmem>>, vector<4x128xf32>
    tpu.vector_store %arg9[%c0_35, %c0_36], %47 {strides = array<i32>} : memref<4x128xf32, #tpu.memory_space<vmem>>, vector<4x128xf32>,
    return
  }
  func.func @transform_0(%arg0: i32) -> (i32, i32) {
    %c0_i32 = arith.constant 0 : i32
    %c0_i32_0 = arith.constant 0 : i32
    return %arg0, %c0_i32 : i32, i32
  }
  func.func @transform_1(%arg0: i32) -> (i32, i32) {
    %c0_i32 = arith.constant 0 : i32
    %c0_i32_0 = arith.constant 0 : i32
    %c0_i32_1 = arith.constant 0 : i32
    return %c0_i32, %c0_i32_0 : i32, i32
  }
  func.func @transform_2(%arg0: i32) -> (i32, i32) {
    %c0_i32 = arith.constant 0 : i32
    %c0_i32_0 = arith.constant 0 : i32
    %c0_i32_1 = arith.constant 0 : i32
    return %c0_i32, %c0_i32_0 : i32, i32
  }
  func.func @transform_3(%arg0: i32) -> (i32, i32, i32) {
    %c0_i32 = arith.constant 0 : i32
    %c0_i32_0 = arith.constant 0 : i32
    %c0_i32_1 = arith.constant 0 : i32
    %c0_i32_2 = arith.constant 0 : i32
    return %c0_i32, %c0_i32_0, %c0_i32_1 : i32, i32, i32
  }
  func.func @transform_4(%arg0: i32) -> (i32, i32) {
    %c0_i32 = arith.constant 0 : i32
    %c0_i32_0 = arith.constant 0 : i32
    %c0_i32_1 = arith.constant 0 : i32
    return %c0_i32, %c0_i32_0 : i32, i32
  }
  func.func @transform_5(%arg0: i32) -> (i32, i32) {
    %c0_i32 = arith.constant 0 : i32
    %c0_i32_0 = arith.constant 0 : i32
    %c0_i32_1 = arith.constant 0 : i32
    return %c0_i32, %c0_i32_0 : i32, i32
  }
  func.func @transform_6(%arg0: i32) -> (i32, i32) {
    %c0_i32 = arith.constant 0 : i32
    %c0_i32_0 = arith.constant 0 : i32
    %c0_i32_1 = arith.constant 0 : i32
    return %c0_i32, %c0_i32_0 : i32, i32
  }
  func.func @transform_7(%arg0: i32) -> (i32, i32) {
    %c0_i32 = arith.constant 0 : i32
    %c0_i32_0 = arith.constant 0 : i32
    %c0_i32_1 = arith.constant 0 : i32
    return %c0_i32, %c0_i32_0 : i32, i32
  }
  func.func @transform_8(%arg0: i32) -> (i32, i32) {
    %c0_i32 = arith.constant 0 : i32
    %c0_i32_0 = arith.constant 0 : i32
    return %arg0, %c0_i32 : i32, i32
  }
}

</mosaic_0001>

<bundles_post_ra>
// kernel: tpu_custom_call.1
= control target key start
LH: loop header
LB: loop body
LE: loop exit
PB: predicated region body
PF: predicated region fallthrough
CT: control target
= control target key end

     0   :  { %13 = vsyncpa [#allocation3], 0  ;;  %s760_s0 = inlined_call_operand.vmem [shape: f32[4,128], index: 0, kind: input, shape index: {}]   ;;  %s761_s1 = inlined_call_operand.vmem [shape: f32[128,32], index: 1, kind: input, shape index: {}]   ;;  %s762_s2 = inlined_call_operand.vmem [shape: f32[32,128], index: 2, kind: input, shape index: {}]   ;;  %s763_s3 = inlined_call_operand.hbm [shape: f32[3,32,32], index: 3, kind: input, shape index: {}]   ;;  %s764_s4 = inlined_call_operand.hbm [shape: f32[32,32], index: 4, kind: input, shape index: {}]   ;;  %s765_s5 = inlined_call_operand.vmem [shape: f32[128,128], index: 5, kind: input, shape index: {}]   ;;  %s766_s6 = inlined_call_operand.hbm [shape: f32[128,128], index: 6, kind: input, shape index: {}]   ;;  %s767_s7 = inlined_call_operand.vmem [shape: f32[1,128], index: 7, kind: input, shape index: {}]   ;;  %s768_s8 = inlined_call_operand.hbm [shape: f32[4,128], index: 8, kind: output, shape index: {}]  }
   0x1   :  { %14 = vsyncpa [#allocation6], 0 }
   0x2   :  { %15 = vsyncpa [#allocation4], 0  ;;  %s39_s29 = sshll.u32 %s764_s4, 4  ;;  %s570_s30 = smov [#allocation5]   ;;  %s40_s29 = int_to_ptr.hbm [resolvable:$true] %s39_s29 }
   0x3   :  { %s41_s9 = sshll.u32 %s570_s30, 4  ;;  %s26_s12 = sshll.u32 %s763_s3, 4  ;;  %s42_s9 = int_to_ptr.vmem [resolvable:$true] %s41_s9  ;;  %s27_s12 = int_to_ptr.hbm [resolvable:$true] %s26_s12 }
   0x4   :  { %s571_s13 = smov 128   ;;  %s572_s14 = smov 8  }
   0x5   :  { %47 = dma.hbm_to_vmem [thread:$0]  %s40_s29, 512, %s42_s9, [#allocation6], %s571_s13, %s571_s13, %s572_s14  }
   0x6   :  { %s573_s15 = smov [#allocation2]   ;;  %s54_s19 = sshll.u32 %s766_s6, 4  ;;  %s55_s19 = int_to_ptr.hbm [resolvable:$true] %s54_s19 }
   0x7   :  { %s28_s16 = sshll.u32 %s573_s15, 4  ;;  %s574_s4 = smov [#allocation7]   ;;  %s29_s16 = int_to_ptr.vmem [resolvable:$true] %s28_s16 }
   0x8   :  { %34 = dma.hbm_to_vmem [thread:$0]  %s27_s12, 1536, %s29_s16, [#allocation3], %s571_s13, %s571_s13, %s572_s14  }
   0x9   :  { %s56_s20 = sshll.u32 %s574_s4, 4  ;;  %s57_s20 = int_to_ptr.vmem [resolvable:$true] %s56_s20 }
   0xa   :  { %62 = dma.hbm_to_vmem [thread:$0]  %s55_s19, 2048, %s57_s20, [#allocation6], %s571_s13, %s571_s13, %s572_s14  }
   0xb   :  { %564 = dma.done.wait [#allocation3], 1536  }
   0xc   :  { %565 = vsyncadd [#allocation3], 4294965760 }
   0xd   :  { %566 = dma.done.wait [#allocation6], 2560  }
   0xe   :  { %567 = vsyncadd [#allocation6], 4294964736  ;;  %v93_v0 = vld [vmem:[%s761_s1 + $0x78] sm:$0xff]  ;;  %v92_v1 = vld [vmem:[%s761_s1 + $0x70] sm:$0xff]  ;;  %vm119_vm0 = vcmask 261120   ;;  %s436_s19 = sshll.u32 %s768_s8, 4  ;;  %s437_s19 = int_to_ptr.hbm [resolvable:$true] %s436_s19 }
   0xf   :  { %94 = vmatpush.msra.mxu0 %v93_v0  ;;  %v91_v2 = vld [vmem:[%s761_s1 + $0x68] sm:$0xff]  ;;  %v90_v3 = vld [vmem:[%s761_s1 + $0x60] sm:$0xff]  ;;  %v89_v4 = vld [vmem:[%s761_s1 + $0x58] sm:$0xff] }
  0x10   :  { %v88_v5 = vld [vmem:[%s761_s1 + $0x50] sm:$0xff]  ;;  %v87_v6 = vld [vmem:[%s761_s1 + $0x48] sm:$0xff]  ;;  %v86_v7 = vld [vmem:[%s761_s1 + $0x40] sm:$0xff] }
  0x11   :  { %95 = vmatpush.msra.mxu0 %v92_v1  ;;  %v85_v8 = vld [vmem:[%s761_s1 + $0x38] sm:$0xff]  ;;  %v84_v9 = vld [vmem:[%s761_s1 + $0x30] sm:$0xff]  ;;  %v83_v10 = vld [vmem:[%s761_s1 + $0x28] sm:$0xff] }
  0x12   :  { %v82_v11 = vld [vmem:[%s761_s1 + $0x20] sm:$0xff]  ;;  %v81_v12 = vld [vmem:[%s761_s1 + $0x18] sm:$0xff]  ;;  %v80_v13 = vld [vmem:[%s761_s1 + $0x10] sm:$0xff] }
  0x13   :  { %96 = vmatpush.msra.mxu0 %v91_v2  ;;  %v79_v14 = vld [vmem:[%s761_s1 + $0x8] sm:$0xff]  ;;  %v78_v15 = vld [vmem:[%s761_s1] sm:$0xff]  ;;  %v118_v17 = vld [vmem:[#allocation2 + $0x18] sm:$0xff] }
  0x14   :  { %v681_v16 = vld [vmem:[%s760_s0] sm:$0xf]  ;;  %v117_v18 = vld [vmem:[#allocation2 + $0x10] sm:$0xff]  ;;  %v116_v19 = vld [vmem:[#allocation2 + $0x8] sm:$0xff] }
  0x15   :  { %97 = vmatpush.msra.mxu0 %v90_v3  ;;  %v115_v20 = vld [vmem:[#allocation2] sm:$0xff]  ;;  %v148_v21 = vld [vmem:[#allocation2 + $0x38] sm:$0xff]  ;;  %v147_v22 = vld [vmem:[#allocation2 + $0x30] sm:$0xff] }
  0x16   :  { %164 = vmatpush.msra.mxu2 %v148_v21  ;;  %v146_v25 = vld [vmem:[#allocation2 + $0x28] sm:$0xff]  ;;  %v145_v26 = vld [vmem:[#allocation2 + $0x20] sm:$0xff]  ;;  %v177_v27 = vld [vmem:[#allocation2 + $0x58] sm:$0xff] }
  0x17   :  { %98 = vmatpush.msra.mxu0 %v89_v4  ;;  %v176_v28 = vld [vmem:[#allocation2 + $0x50] sm:$0xff]  ;;  %193 = vmatpush.msra.mxu3 %v177_v27  ;;  %v175_v31 = vld [vmem:[#allocation2 + $0x48] sm:$0xff]  ;;  %v174_v32 = vld [vmem:[#allocation2 + $0x40] sm:$0xff] }
  0x18   :  { %165 = vmatpush.msra.mxu2 %v147_v22  ;;  %v208_v35 = vld [vmem:[#allocation5 + $0x18] sm:$0xff]  ;;  %v207_v36 = vld [vmem:[#allocation5 + $0x10] sm:$0xff]  ;;  %v206_v37 = vld [vmem:[#allocation5 + $0x8] sm:$0xff] }
  0x19   :  { %99 = vmatpush.msra.mxu0 %v88_v5  ;;  %194 = vmatpush.msra.mxu3 %v176_v28  ;;  %v205_v38 = vld [vmem:[#allocation5] sm:$0xff]  ;;  %v250_v44 = vld [vmem:[%s762_s2 + $0x18] sm:$0xff]  ;;  %v249_v45 = vld [vmem:[%s762_s2 + $0x10] sm:$0xff] }
  0x1a   :  { %166 = vmatpush.msra.mxu2 %v146_v25  ;;  %224 = vmatpush.msra.mxu1 %v208_v35  ;;  %v248_v46 = vld [vmem:[%s762_s2 + $0x8] sm:$0xff]  ;;  %v247_v47 = vld [vmem:[%s762_s2] sm:$0xff]  ;;  %v290_v48 = vld [vmem:[%s765_s5 + $0x78] sm:$0xff] }
  0x1b   :  { %100 = vmatpush.msra.mxu0 %v87_v6  ;;  %195 = vmatpush.msra.mxu3 %v175_v31  ;;  %v289_v49 = vld [vmem:[%s765_s5 + $0x70] sm:$0xff]  ;;  %v288_v50 = vld [vmem:[%s765_s5 + $0x68] sm:$0xff]  ;;  %v287_v51 = vld [vmem:[%s765_s5 + $0x60] sm:$0xff] }
  0x1c   :  { %167 = vmatpush.msra.mxu2 %v145_v26  ;;  %225 = vmatpush.msra.mxu1 %v207_v36  ;;  %v286_v52 = vld [vmem:[%s765_s5 + $0x58] sm:$0xff]  ;;  %v285_v53 = vld [vmem:[%s765_s5 + $0x50] sm:$0xff]  ;;  %v284_v54 = vld [vmem:[%s765_s5 + $0x48] sm:$0xff] }
  0x1d   :  { %101 = vmatpush.msra.mxu0 %v86_v7  ;;  %196 = vmatpush.msra.mxu3 %v174_v32  ;;  %v283_v56 = vld [vmem:[%s765_s5 + $0x40] sm:$0xff]  ;;  %v282_v57 = vld [vmem:[%s765_s5 + $0x38] sm:$0xff]  ;;  %v281_v58 = vld [vmem:[%s765_s5 + $0x30] sm:$0xff] }
  0x1e   :  { %226 = vmatpush.msra.mxu1 %v206_v37  ;;  %266 = vmatpush.msrb.mxu2 %v250_v44  ;;  %v280_v59 = vld [vmem:[%s765_s5 + $0x28] sm:$0xff]  ;;  %v279_v62 = vld [vmem:[%s765_s5 + $0x20] sm:$0xff]  ;;  %v278_v0 = vld [vmem:[%s765_s5 + $0x18] sm:$0xff] }
  0x1f   :  { %102 = vmatpush.msra.mxu0 %v85_v8  ;;  %291 = vmatpush.msrb.mxu3 %v290_v48  ;;  %v277_v4 = vld [vmem:[%s765_s5 + $0x10] sm:$0xff]  ;;  %v355_v22 = vld [vmem:[#allocation7 + $0x58] sm:$0xff]  ;;  %v349_v27 = vld [vmem:[#allocation7 + $0x28] sm:$0xff] }
  0x20   :  { %227 = vmatpush.msra.mxu1 %v205_v38  ;;  %267 = vmatpush.msrb.mxu2 %v249_v45  ;;  %v351_v25 = vld [vmem:[#allocation7 + $0x38] sm:$0xff]  ;;  %v350_v26 = vld [vmem:[#allocation7 + $0x30] sm:$0xff]  ;;  %v348_v28 = vld [vmem:[#allocation7 + $0x20] sm:$0xff] }
  0x21   :  { %103 = vmatpush.msra.mxu0 %v84_v9  ;;  %292 = vmatpush.msrb.mxu3 %v289_v49  ;;  %v345_v31 = vld [vmem:[#allocation7 + $0x8] sm:$0xff]  ;;  %v344_v32 = vld [vmem:[#allocation7] sm:$0xff] }
  0x22   :  { %268 = vmatpush.msrb.mxu2 %v248_v46  ;;  %313 = vmatpush.msrb.mxu1 %v290_v48 }
  0x23   :  { %104 = vmatpush.msra.mxu0 %v83_v10  ;;  %293 = vmatpush.msrb.mxu3 %v288_v50  ;;  %v276_v10 = vld [vmem:[%s765_s5 + $0x8] sm:$0xff] }
  0x24   :  { %269 = vmatpush.msrb.mxu2 %v247_v47  ;;  %314 = vmatpush.msrb.mxu1 %v289_v49 }
  0x25   :  { %105 = vmatpush.msra.mxu0 %v82_v11  ;;  %294 = vmatpush.msrb.mxu3 %v287_v51  ;;  %v275_v11 = vld [vmem:[%s765_s5] sm:$0xff] }
  0x26   :  { %315 = vmatpush.msrb.mxu1 %v288_v50 }
  0x27   :  { %106 = vmatpush.msra.mxu0 %v81_v12  ;;  %295 = vmatpush.msrb.mxu3 %v286_v52 }
  0x28   :  { %316 = vmatpush.msrb.mxu1 %v287_v51 }
  0x29   :  { %107 = vmatpush.msra.mxu0 %v80_v13  ;;  %296 = vmatpush.msrb.mxu3 %v285_v53 }
  0x2a   :  { %317 = vmatpush.msrb.mxu1 %v286_v52 }
  0x2b   :  { %108 = vmatpush.msra.mxu0 %v79_v14  ;;  %297 = vmatpush.msrb.mxu3 %v284_v54  ;;  %v359_v14 = vld [vmem:[#allocation7 + $0x78] sm:$0xff] }
  0x2c   :  { %318 = vmatpush.msrb.mxu1 %v285_v53 }
  0x2d   :  { %109 = vmatpush.msra.mxu0 %v78_v15  ;;  %298 = vmatpush.msrb.mxu3 %v283_v56  ;;  %v358_v15 = vld [vmem:[#allocation7 + $0x70] sm:$0xff] }
  0x2e   :  { %110 = vmatmul.f32.vlgmr.msra.gmra.mxu0 %v681_v16  ;;  %319 = vmatpush.msrb.mxu1 %v284_v54 }
  0x2f   :  { %135 = vmatpush.msrb.mxu0 %v118_v17  ;;  %299 = vmatpush.msrb.mxu3 %v282_v57  ;;  %v357_v17 = vld [vmem:[#allocation7 + $0x68] sm:$0xff] }
  0x30   :  { %320 = vmatpush.msrb.mxu1 %v283_v56 }
  0x31   :  { %136 = vmatpush.msrb.mxu0 %v117_v18  ;;  %300 = vmatpush.msrb.mxu3 %v281_v58  ;;  %v356_v18 = vld [vmem:[#allocation7 + $0x60] sm:$0xff] }
  0x32   :  { %321 = vmatpush.msrb.mxu1 %v282_v57 }
  0x33   :  { %137 = vmatpush.msrb.mxu0 %v116_v19  ;;  %301 = vmatpush.msrb.mxu3 %v280_v59 }
  0x34   :  { %322 = vmatpush.msrb.mxu1 %v281_v58 }
  0x35   :  { %138 = vmatpush.msrb.mxu0 %v115_v20  ;;  %302 = vmatpush.msrb.mxu3 %v279_v62 }
  0x36   :  { %323 = vmatpush.msrb.mxu1 %v280_v59 }
  0x37   :  { %303 = vmatpush.msrb.mxu3 %v278_v0 }
  0x38   :  { %324 = vmatpush.msrb.mxu1 %v279_v62 }
  0x39   :  { %304 = vmatpush.msrb.mxu3 %v277_v4 }
  0x3a   :  { %325 = vmatpush.msrb.mxu1 %v278_v0 }
  0x3b   :  { %305 = vmatpush.msrb.mxu3 %v276_v10 }
  0x3c   :  { %326 = vmatpush.msrb.mxu1 %v277_v4 }
  0x3d   :  { %306 = vmatpush.msrb.mxu3 %v275_v11 }
  0x3e   :  { %327 = vmatpush.msrb.mxu1 %v276_v10 }
  0x40   :  { %328 = vmatpush.msrb.mxu1 %v275_v11 }
  0xab   :  { %v111_v23 = vpop.f32.mrf.mxu0 }
  0xac   :  { %v114_v24 = vmul.f32 0.17677669, %v111_v23  ;;  %v354_v23 = vld [vmem:[#allocation7 + $0x50] sm:$0xff] }
  0xae   :  { %447 = vmatmul.msk.f32.vlgmr.msrb.gmra.mxu0 %vm119_vm0, %v114_v24 }
 0x12b   :  { %v140_v29 = vpop.f32.mrf.mxu0 }
 0x12c   :  { %v143_v30 = vmax.f32 %v114_v24, %v140_v29  ;;  %v347_v29 = vld [vmem:[#allocation7 + $0x18] sm:$0xff] }
 0x12e   :  { %448 = vmatmul.msk.f32.vlgmr.msra.gmra.mxu2 %vm119_vm0, %v143_v30 }
 0x12f   :  { %364 = vmatpush.msra.mxu2 %v359_v14 }
 0x131   :  { %365 = vmatpush.msra.mxu2 %v358_v15 }
 0x133   :  { %366 = vmatpush.msra.mxu2 %v357_v17 }
 0x135   :  { %367 = vmatpush.msra.mxu2 %v356_v18 }
 0x137   :  { %368 = vmatpush.msra.mxu2 %v355_v22 }
 0x139   :  { %369 = vmatpush.msra.mxu2 %v354_v23 }
 0x1b1   :  { %v169_v33 = vpop.f32.mrf.mxu2 }
 0x1b2   :  { %v172_v34 = vmax.f32 %v143_v30, %v169_v33  ;;  %v346_v30 = vld [vmem:[#allocation7 + $0x10] sm:$0xff] }
 0x1b4   :  { %449 = vmatmul.msk.f32.vlgmr.msra.gmra.mxu3 %vm119_vm0, %v172_v34 }
 0x237   :  { %v198_v39 = vpop.f32.mrf.mxu3 }
 0x238   :  { %v201_v40 = vmax.f32 %v172_v34, %v198_v39 }
 0x23a   :  { %v202_v41 = vsub.f32 %v114_v24, %v201_v40  ;;  %v353_v24 = vld [vmem:[#allocation7 + $0x48] sm:$0xff] }
 0x23b   :  { %370 = vmatpush.msra.mxu2 %v353_v24 }
 0x23c   :  { %v203_v42 = vmul.f32 1.442695, %v202_v41 }
 0x23e   :  { %460 = vpow2.f32 %v203_v42 }
 0x244   :  { %v687_v43 = vpop.eup %460 }
 0x245   :  { %450 = vmatmul.msk.f32.vlgmr.msra.gmra.mxu1 %vm119_vm0, %v687_v43 }
 0x2c2   :  { %v229_v55 = vpop.f32.mrf.mxu1 }
 0x2c3   :  { %462 = vrcp.f32 %v229_v55  ;;  %v243_v1 = vand.u32 2147483648, %v229_v55  ;;  %v241_v3 = vand.u32 2147483647, %v229_v55  ;;  %vm237_vm2 = vweird.f32 %v229_v55 }
 0x2c5   :  { %v244_v6 = vor.u32 1.1754944e-38, %v243_v1  ;;  %vm242_vm4 = vcmp.eq.f32.partialorder %v241_v3, 8.507059e+37 }
 0x2c9   :  { %v463_v60 = vpop.eup %462 }
 0x2ca   :  { %v233_v61 = vmul.f32 %v463_v60, %v229_v55  ;;  %vm238_vm1 = vweird.f32 %v463_v60 }
 0x2cb   :  { %vm239_vm3 = vmor %vm237_vm2, %vm238_vm1 }
 0x2cc   :  { %v234_v63 = vsub.f32 1.0, %v233_v61 }
 0x2ce   :  { %v235_v2 = vmul.f32 %v463_v60, %v234_v63 }
 0x2d0   :  { %v236_v5 = vadd.f32 %v463_v60, %v235_v2 }
 0x2d2   :  { %v240_v7 = vsel %vm239_vm3, %v463_v60, %v236_v5 }
 0x2d3   :  { %v245_v8 = vsel %vm242_vm4, %v244_v6, %v240_v7 }
 0x2d4   :  { %v246_v9 = vmul.f32 %v687_v43, %v245_v8  ;;  %v459_v43 = vld [vmem:[%s767_s7] ss:$0 sm:$0xff]  ;;  %s575_s7 = smov [#allocation8]  }
 0x2d5   :  { %s434_s17 = sshll.u32 %s575_s7, 4  ;;  %s435_s17 = int_to_ptr.vmem [resolvable:$true] %s434_s17 }
 0x2d6   :  { %451 = vmatmul.msk.f32.vlgmr.msrb.gmra.mxu2 %vm119_vm0, %v246_v9 }
 0x359   :  { %v271_v12 = vpop.f32.mrf.mxu2 }
 0x35a   :  { %v274_v13 = vadd.f32 %v271_v12, %v681_v16  ;;  %v352_v16 = vld [vmem:[#allocation7 + $0x40] sm:$0xff] }
 0x35b   :  { %371 = vmatpush.msra.mxu2 %v352_v16 }
 0x35c   :  { %307 = vmatmul.f32.vlgmr.msrb.gmra.mxu3 %v274_v13 }
 0x35d   :  { %372 = vmatpush.msra.mxu2 %v351_v25 }
 0x35f   :  { %373 = vmatpush.msra.mxu2 %v350_v26 }
 0x361   :  { %374 = vmatpush.msra.mxu2 %v349_v27 }
 0x363   :  { %375 = vmatpush.msra.mxu2 %v348_v28 }
 0x365   :  { %376 = vmatpush.msra.mxu2 %v347_v29 }
 0x367   :  { %377 = vmatpush.msra.mxu2 %v346_v30 }
 0x369   :  { %378 = vmatpush.msra.mxu2 %v345_v31 }
 0x36b   :  { %379 = vmatpush.msra.mxu2 %v344_v32 }
 0x3df   :  { %v308_v19 = vpop.f32.mrf.mxu3 }
 0x3e0   :  { %v311_v20 = vsub.f32 %v274_v13, %v308_v19 }
 0x3e2   :  { %v312_v21 = vmul.f32 %v311_v20, %v311_v20 }
 0x3e4   :  { %329 = vmatmul.f32.vlgmr.msrb.gmra.mxu1 %v312_v21 }
 0x461   :  { %v330_v33 = vpop.f32.mrf.mxu1 }
 0x462   :  { %v331_v34 = vadd.f32 1e-05, %v330_v33 }
 0x464   :  { %464 = vrsqrt.f32 %v331_v34  ;;  %vm339_vm6 = vweird.f32 %v331_v34 }
 0x46a   :  { %v465_v35 = vpop.eup %464 }
 0x46b   :  { %v334_v36 = vmul.f32 %v465_v35, %v331_v34  ;;  %vm340_vm5 = vweird.f32 %v465_v35 }
 0x46c   :  { %vm341_vm7 = vmor %vm339_vm6, %vm340_vm5 }
 0x46d   :  { %v335_v37 = vmul.f32 %v465_v35, %v334_v36 }
 0x46f   :  { %v336_v38 = vmul.f32 0.5, %v335_v37 }
 0x471   :  { %v337_v39 = vsub.f32 1.5, %v336_v38 }
 0x473   :  { %v338_v40 = vmul.f32 %v465_v35, %v337_v39 }
 0x475   :  { %v342_v41 = vsel %vm341_vm7, %v465_v35, %v338_v40 }
 0x476   :  { %v343_v42 = vmul.f32 %v342_v41, %v311_v20 }
 0x478   :  { %380 = vmatmul.f32.vlgmr.msra.gmra.mxu2 %v343_v42 }
 0x4fb   :  { %v381_v44 = vpop.f32.mrf.mxu2 }
 0x4fc   :  { %v382_v45 = vadd.f32 %v459_v43, %v381_v44 }
 0x4fe   :  { %v385_v46 = vmul.f32 0.70710677, %v382_v45  ;;  %v384_v19 = vmul.f32 0.5, %v382_v45 }
 0x500   :  { %v386_v47 = vmul.f32 %v385_v46, %v385_v46 }
 0x502   :  { %v387_v48 = vmin.f32 %v386_v47, 16.0 }
 0x504   :  { %v388_v49 = vmul.f32 2.1237322e-06, %v387_v48  ;;  %v399_v50 = vmul.f32 3.8918573e-05, %v387_v48 }
 0x506   :  { %v389_v51 = vadd.f32 0.00028619796, %v388_v49  ;;  %v400_v52 = vadd.f32 0.001143296, %v399_v50 }
 0x508   :  { %v390_v53 = vmul.f32 %v389_v51, %v387_v48  ;;  %v401_v54 = vmul.f32 %v400_v52, %v387_v48 }
 0x50a   :  { %v402_v55 = vadd.f32 0.014752088, %v401_v54  ;;  %v391_v56 = vadd.f32 0.0036580483, %v390_v53 }
 0x50c   :  { %v403_v57 = vmul.f32 %v402_v55, %v387_v48  ;;  %v392_v59 = vmul.f32 %v391_v56, %v387_v48 }
 0x50e   :  { %v404_v58 = vadd.f32 0.112945676, %v403_v57  ;;  %v393_v62 = vadd.f32 0.05243302, %v392_v59 }
 0x510   :  { %v405_v60 = vmul.f32 %v404_v58, %v387_v48  ;;  %v394_v1 = vmul.f32 %v393_v62, %v387_v48 }
 0x512   :  { %v406_v61 = vadd.f32 0.4994258, %v405_v60  ;;  %v395_v2 = vadd.f32 0.18741608, %v394_v1 }
 0x514   :  { %v407_v63 = vmul.f32 %v406_v61, %v387_v48  ;;  %v396_v4 = vmul.f32 %v395_v2, %v387_v48 }
 0x516   :  { %v408_v0 = vadd.f32 1.0, %v407_v63  ;;  %v397_v8 = vadd.f32 1.1283791, %v396_v4 }
 0x518   :  { %466 = vrcp.f32 %v408_v0  ;;  %v420_v7 = vand.u32 2147483648, %v408_v0  ;;  %v418_v10 = vand.u32 2147483647, %v408_v0  ;;  %vm414_vm9 = vweird.f32 %v408_v0 }
 0x519   :  { %v398_v13 = vmul.f32 %v397_v8, %v385_v46 }
 0x51a   :  { %v421_v12 = vor.u32 1.1754944e-38, %v420_v7  ;;  %vm419_vm11 = vcmp.eq.f32.partialorder %v418_v10, 8.507059e+37 }
 0x51e   :  { %v467_v3 = vpop.eup %466 }
 0x51f   :  { %v410_v5 = vmul.f32 %v467_v3, %v408_v0  ;;  %vm415_vm8 = vweird.f32 %v467_v3 }
 0x520   :  { %vm416_vm10 = vmor %vm414_vm9, %vm415_vm8 }
 0x521   :  { %v411_v6 = vsub.f32 1.0, %v410_v5 }
 0x523   :  { %v412_v9 = vmul.f32 %v467_v3, %v411_v6 }
 0x525   :  { %v413_v11 = vadd.f32 %v467_v3, %v412_v9 }
 0x527   :  { %v417_v14 = vsel %vm416_vm10, %v467_v3, %v413_v11 }
 0x528   :  { %v422_v15 = vsel %vm419_vm11, %v421_v12, %v417_v14 }
 0x529   :  { %v423_v17 = vmul.f32 %v422_v15, %v398_v13 }
 0x52b   :  { %v452_v18 = vclamps-f32 %v423_v17, 1.0 }
 0x52d   :  { %v426_v20 = vadd.f32 1.0, %v452_v18 }
 0x52f   :  { %v427_v21 = vmul.f32 %v426_v20, %v384_v19 }
 0x531   :  { %428 = vst [vmem:[#allocation8] sm:$0xf] %v427_v21 }
 0x532   :  { %439 = dma.vmem_to_hbm [thread:$0]  %s435_s17, 64, %s437_s19, [#allocation4]  }
 0x533   :  { %568 = dma.done.wait [#allocation4], 64  }
 0x534   :  { %569 = vsyncadd [#allocation4], 4294967232 }
 0x535   :  { %444 = vsyncpa [#allocation3], 1 }
 0x536   :  { %445 = vsyncpa [#allocation6], 1 }
 0x537   :  { %446 = vsyncpa [#allocation4], 1 }

</bundles_post_ra>
